<compile_context>
chip_gen: v7x
topology: tpu7x:2x2x1
jax: 0.10.0
libtpu: 0.0.40
codegen_flags: <defaults>
</compile_context>

<pallas_src>
import functools

import jax
import jax.numpy as jnp
from jax.experimental import pallas as pl
from jax.experimental.pallas import tpu as pltpu


def _round_up(x, m):
    return (x + m - 1) // m * m


def _rope_kernel(pos_ref, inv_freq_ref, cos_ref, sin_ref, *, attention_scaling):
    # pos_ref:      (tm, 1)      float32 positions for this row tile
    # inv_freq_ref: (1, half)    float32 inverse frequencies (constant block)
    pos = pos_ref[...]                      # (tm, 1)
    inv = inv_freq_ref[...]                 # (1, half)
    freqs = pos * inv                       # (tm, half) outer product via broadcast
    emb = jnp.concatenate([freqs, freqs], axis=-1)   # (tm, dim)
    cos = jnp.cos(emb) * attention_scaling  # EUP transcendentals, f32
    sin = jnp.sin(emb) * attention_scaling
    cos_ref[...] = cos.astype(cos_ref.dtype)
    sin_ref[...] = sin.astype(sin_ref.dtype)


def qwen2_vl_rotary_embedding(
    position_ids,
    inv_freq,
    *,
    attention_scaling=1.0,
    out_dtype=jnp.float32,
    row_tile=1024,
):
    """Returns (cos, sin), each of shape (3, batch, seq, 2 * inv_freq.shape[0])."""
    three, batch, seq = position_ids.shape
    half = inv_freq.shape[0]
    dim = 2 * half

    rows = three * batch * seq
    pos2d = position_ids.reshape(rows, 1).astype(jnp.float32)

    # Largest row tile <= row_tile, multiple of 8 sublanes; pad rows to a tile
    # multiple so the grid is a clean cdiv (no single-giant-block fallback).
    tm = min(row_tile, _round_up(rows, 8))
    rows_padded = _round_up(rows, tm)
    if rows_padded != rows:
        pos2d = jnp.pad(pos2d, ((0, rows_padded - rows), (0, 0)))

    inv2d = inv_freq.reshape(1, half).astype(jnp.float32)

    grid = (rows_padded // tm,)

    # VMEM budget: 2 outputs * (tm, dim) f32 * 2 (double buffer) + tiny inputs
    # + in-kernel f32 temporaries; 64 MiB scoped limit leaves ample headroom on
    # v5e/v6e (128 MiB physical) and fits v7x's 64 MiB VMEM.
    kernel = functools.partial(
        _rope_kernel, attention_scaling=float(attention_scaling)
    )

    cos2d, sin2d = pl.pallas_call(
        kernel,
        out_shape=(
            jax.ShapeDtypeStruct((rows_padded, dim), out_dtype),
            jax.ShapeDtypeStruct((rows_padded, dim), out_dtype),
        ),
        grid_spec=pltpu.PrefetchScalarGridSpec(
            num_scalar_prefetch=0,
            grid=grid,
            in_specs=[
                pl.BlockSpec((tm, 1), lambda i: (i, 0)),      # positions (row tile)
                pl.BlockSpec((1, half), lambda i: (0, 0)),    # inv_freq (constant)
            ],
            out_specs=[
                pl.BlockSpec((tm, dim), lambda i: (i, 0)),    # cos
                pl.BlockSpec((tm, dim), lambda i: (i, 0)),    # sin
            ],
        ),
        compiler_params=pltpu.CompilerParams(
            dimension_semantics=("parallel",),
            vmem_limit_bytes=64 * 1024 * 1024,
        ),
    )(pos2d, inv2d)

    cos = cos2d[:rows].reshape(three, batch, seq, dim)
    sin = sin2d[:rows].reshape(three, batch, seq, dim)
    return cos, sin


def _reference_rotary(position_ids, inv_freq, attention_scaling, out_dtype):
    """Pure-JAX mirror of the PyTorch forward (default rope_type)."""
    three, batch, seq = position_ids.shape
    half = inv_freq.shape[0]
    inv_freq_expanded = jnp.broadcast_to(
        inv_freq[None, None, :, None].astype(jnp.float32),
        (three, batch, half, 1),
    )
    position_ids_expanded = position_ids[:, :, None, :].astype(jnp.float32)
    freqs = jnp.matmul(inv_freq_expanded, position_ids_expanded)   # (3,B,half,S)
    freqs = jnp.transpose(freqs, (0, 1, 3, 2))                     # (3,B,S,half)
    emb = jnp.concatenate([freqs, freqs], axis=-1)                 # (3,B,S,dim)
    cos = jnp.cos(emb) * attention_scaling
    sin = jnp.sin(emb) * attention_scaling
    return cos.astype(out_dtype), sin.astype(out_dtype)


if __name__ == "__main__":
    # Small shapes consistent with the module's forward:
    #   x            : (batch, seq, hidden)  -- only its dtype is used
    #   position_ids : (3, batch, seq)       -- Qwen2-VL's 3 rope axes
    batch, seq, dim = 2, 8, 32
    base = 10000.0
    attention_scaling = 1.0  # rope_type='default'

    key = jax.random.PRNGKey(0)
    k_pos, k_x = jax.random.split(key)

    position_ids = jax.random.randint(
        k_pos, (3, batch, seq), minval=0, maxval=2048, dtype=jnp.int32
    )
    x = jax.random.normal(k_x, (batch, seq, 64), dtype=jnp.float32)

    # Default rope init: inv_freq = 1 / base^(2i/dim), i = 0 .. dim/2 - 1
    inv_freq = 1.0 / (
        base ** (jnp.arange(0, dim, 2, dtype=jnp.float32) / float(dim))
    )

    cos, sin = qwen2_vl_rotary_embedding(
        position_ids,
        inv_freq,
        attention_scaling=attention_scaling,
        out_dtype=x.dtype,
    )
    cos, sin = jax.block_until_ready((cos, sin))

    ref_cos, ref_sin = _reference_rotary(
        position_ids, inv_freq, attention_scaling, x.dtype
    )

    assert cos.shape == (3, batch, seq, dim)
    assert sin.shape == (3, batch, seq, dim)
    assert cos.dtype == x.dtype and sin.dtype == x.dtype
    assert jnp.allclose(cos, ref_cos, atol=1e-3, rtol=1e-3)
    assert jnp.allclose(sin, ref_sin, atol=1e-3, rtol=1e-3)

    print("KERNEL_OK")
</pallas_src>

<mosaic_0001>
module attributes {stable_mosaic.version = 11 : i64} {
  func.func @_rope_kernel(%arg0: i32, %arg1: memref<48x1xf32, #tpu.memory_space<vmem>>, %arg2: memref<1x16xf32, #tpu.memory_space<vmem>>, %arg3: memref<48x32xf32, #tpu.memory_space<vmem>>, %arg4: memref<48x32xf32, #tpu.memory_space<vmem>>) attributes {dimension_semantics = [#tpu.dimension_semantics<parallel>], iteration_bounds = array<i64: 1>, scalar_prefetch = 0 : i64, scratch_operands = 0 : i64, tpu.core_type = #tpu.core_type<tc>, window_params = [{transform_indices = @transform_0, window_bounds = array<i64: 48, 1>}, {pipeline_mode = #tpu.pipeline_mode<synchronous>, transform_indices = @transform_1, window_bounds = array<i64: 1, 16>}, {transform_indices = @transform_2, window_bounds = array<i64: 48, 32>}, {transform_indices = @transform_3, window_bounds = array<i64: 48, 32>}]} {
    %c0 = arith.constant 0 : index
    %c0_0 = arith.constant 0 : index
    %0 = vector.load %arg1[%c0, %c0_0] : memref<48x1xf32, #tpu.memory_space<vmem>>, vector<48x1xf32>
    %c0_1 = arith.constant 0 : index
    %c0_2 = arith.constant 0 : index
    %1 = vector.load %arg2[%c0_1, %c0_2] : memref<1x16xf32, #tpu.memory_space<vmem>>, vector<1x16xf32>
    %2 = vector.broadcast %0 : vector<48x1xf32> to vector<48x16xf32>
    %3 = vector.broadcast %1 : vector<1x16xf32> to vector<48x16xf32>
    %4 = arith.mulf %2, %3 : vector<48x16xf32>
    %5 = tpu.concatenate %4, %4 in 1 : vector<48x16xf32>, vector<48x16xf32> -> vector<48x32xf32>
    %6 = math.cos %5 : vector<48x32xf32>
    %cst = arith.constant 1.000000e+00 : f32
    %7 = vector.broadcast %cst : f32 to vector<48x32xf32>
    %8 = arith.mulf %6, %7 : vector<48x32xf32>
    %9 = math.sin %5 : vector<48x32xf32>
    %cst_3 = arith.constant 1.000000e+00 : f32
    %10 = vector.broadcast %cst_3 : f32 to vector<48x32xf32>
    %11 = arith.mulf %9, %10 : vector<48x32xf32>
    %c0_4 = arith.constant 0 : index
    %c0_5 = arith.constant 0 : index
    %12 = vector.load %arg3[%c0_4, %c0_5] : memref<48x32xf32, #tpu.memory_space<vmem>>, vector<48x32xf32>
    tpu.vector_store %arg3[%c0_4, %c0_5], %8 {strides = array<i32>} : memref<48x32xf32, #tpu.memory_space<vmem>>, vector<48x32xf32>,
    %c0_6 = arith.constant 0 : index
    %c0_7 = arith.constant 0 : index
    %13 = vector.load %arg4[%c0_6, %c0_7] : memref<48x32xf32, #tpu.memory_space<vmem>>, vector<48x32xf32>
    tpu.vector_store %arg4[%c0_6, %c0_7], %11 {strides = array<i32>} : memref<48x32xf32, #tpu.memory_space<vmem>>, vector<48x32xf32>,
    return
  }
  func.func @transform_0(%arg0: i32) -> (i32, i32) {
    %c0_i32 = arith.constant 0 : i32
    %c0_i32_0 = arith.constant 0 : i32
    return %arg0, %c0_i32 : i32, i32
  }
  func.func @transform_1(%arg0: i32) -> (i32, i32) {
    %c0_i32 = arith.constant 0 : i32
    %c0_i32_0 = arith.constant 0 : i32
    %c0_i32_1 = arith.constant 0 : i32
    return %c0_i32, %c0_i32_0 : i32, i32
  }
  func.func @transform_2(%arg0: i32) -> (i32, i32) {
    %c0_i32 = arith.constant 0 : i32
    %c0_i32_0 = arith.constant 0 : i32
    return %arg0, %c0_i32 : i32, i32
  }
  func.func @transform_3(%arg0: i32) -> (i32, i32) {
    %c0_i32 = arith.constant 0 : i32
    %c0_i32_0 = arith.constant 0 : i32
    return %arg0, %c0_i32 : i32, i32
  }
}

</mosaic_0001>

<bundles_post_ra>
// kernel: tpu_custom_call.1
= control target key start
LH: loop header
LB: loop body
LE: loop exit
PB: predicated region body
PF: predicated region fallthrough
CT: control target
= control target key end

     0   :  { %9 = vsyncpa [#allocation3], 0  ;;  %s2226_s0 = inlined_call_operand.hbm [shape: f32[48,1], index: 0, kind: input, shape index: {}]   ;;  %s2227_s1 = inlined_call_operand.hbm [shape: f32[1,16], index: 1, kind: input, shape index: {}]   ;;  %s2228_s2 = inlined_call_operand.hbm [shape: f32[48,32], index: 2, kind: output, shape index: {0}]   ;;  %s2229_s3 = inlined_call_operand.hbm [shape: f32[48,32], index: 3, kind: output, shape index: {1}]  }
   0x1   :  { %10 = vsyncpa [#allocation6], 0 }
   0x2   :  { %11 = vsyncpa [#allocation4], 0 }
   0x3   :  { %12 = vsyncpa [#allocation9], 0  ;;  %s1619_s12 = smov [#allocation2]   ;;  %s1523_s16 = scalar_lea.hbm %s2226_s0, 768 }
   0x4   :  { %s18_s13 = sshll.u32 %s1619_s12, 4  ;;  %p1524_p0 = scmp.ne.s32.totalorder %s2226_s0, %s1523_s16  ;;  %s19_s13 = int_to_ptr.vmem [resolvable:$true] %s18_s13 }
   0x5   :  { %p1527_p1 = scmp.lt.u32.totalorder %s1523_s16, %s2226_s0 }
   0x7   :  { %p1529_p2 = pnand %p1527_p1, %p1524_p0 }
   0x9   :  { %1532 = shalt.err (!%p1529_p2)
}
   0xa   :  { %s1533_s21 = scalar_lea.vmem %s19_s13, 768  ;;  %p1538_p4 = scmp.lt.s32.totalorder %s19_s13, %s19_s13 }
   0xb   :  { %p1534_p3 = scmp.ne.s32.totalorder %s19_s13, %s1533_s21  ;;  %p1539_p5 = scmp.lt.s32.totalorder %s1533_s21, %s1533_s21 }
   0xd   :  { %p1540_p6 = por %p1539_p5, %p1538_p4 }
   0xf   :  { %p1541_p7 = pnand %p1540_p6, %p1534_p3 }
  0x11   :  { %1544 = shalt.err (!%p1541_p7)
}
  0x12   :  { %s1620_s22 = smov 128   ;;  %s1621_s23 = smov 8  }
  0x13   :  { %24 = dma.hbm_to_vmem [thread:$0]  %s2226_s0, 768, %s19_s13, [#allocation3], %s1620_s22, %s1620_s22, %s1621_s23  }
  0x14   :  { %s1622_s26 = smov [#allocation5]   ;;  %s1545_s30 = scalar_lea.hbm %s2227_s1, 16 }
  0x15   :  { %s31_s27 = sshll.u32 %s1622_s26, 4  ;;  %p1546_p8 = scmp.ne.s32.totalorder %s2227_s1, %s1545_s30  ;;  %s32_s27 = int_to_ptr.vmem [resolvable:$true] %s31_s27 }
  0x16   :  { %p1549_p9 = scmp.lt.u32.totalorder %s1545_s30, %s2227_s1 }
  0x18   :  { %p1551_p10 = pnand %p1549_p9, %p1546_p8 }
  0x1a   :  { %1554 = shalt.err (!%p1551_p10)
}
  0x1b   :  { %s1555_s8 = scalar_lea.vmem %s32_s27, 16  ;;  %s1559_s0 = scalar_lea.vmem %s32_s27, 32 }
  0x1c   :  { %p1556_p11 = scmp.ne.s32.totalorder %s32_s27, %s1555_s8  ;;  %p1560_p12 = scmp.lt.s32.totalorder %s32_s27, %s32_s27 }
  0x1d   :  { %p1561_p13 = scmp.lt.s32.totalorder %s1559_s0, %s1555_s8 }
  0x1f   :  { %p1562_p0 = por %p1561_p13, %p1560_p12 }
  0x21   :  { %p1563_p1 = pnand %p1562_p0, %p1556_p11 }
  0x23   :  { %1566 = shalt.err (!%p1563_p1)
}
  0x24   :  { %34 = dma.hbm_to_vmem [thread:$0]  %s2227_s1, 16, %s32_s27, [#allocation6]  }
  0x25   :  { %1611 = dma.done.wait [#allocation3], 768  }
  0x26   :  { %1612 = vsyncadd [#allocation3], 4294966528 }
  0x27   :  { %1613 = dma.done.wait [#allocation6], 16  }
  0x28   :  { %1614 = vsyncadd [#allocation6], 4294967280  ;;  %v1623_v0 = vmov 0   ;;  %v43_v1 = vld [vmem:[#allocation2 + $0x10] sm:$0xff]  ;;  %v41_v2 = vld [vmem:[#allocation2] sm:$0xff]  ;;  %s1624_s1 = smov 16  }
  0x29   :  { %1498 = vset.pattern.permute.xlu1 %v1623_v0  ;;  %1497 = vset.pattern.permute.xlu0 %v1623_v0  ;;  %v44_v3 = vld [vmem:[#allocation2 + $0x18] sm:$0xff]  ;;  %v42_v4 = vld [vmem:[#allocation2 + $0x8] sm:$0xff]  ;;  %v45_v6 = vld [vmem:[#allocation2 + $0x20] sm:$0xff]  ;;  %vm114_vm0 = vcmask 130048   ;;  %v1625_v47 = vmov 683565275  }
  0x2a   :  { %60 = vperm.xlu1 %1498, %v43_v1   ;;  %50 = vperm.xlu0 %1497, %v41_v2   ;;  %v46_v5 = vld [vmem:[#allocation2 + $0x28] sm:$0xff]  ;;  %v1410_v7 = vld [vmem:[#allocation5] ss:$0 sm:$0xff]  ;;  %v1626_v49 = vmov 2475754826   ;;  %s1631_s11 = smov [#allocation7]  }
  0x2b   :  { %v1627_v52 = vmov 2131351028   ;;  %v1628_v54 = vmov 2102212464   ;;  %v1629_v56 = vmov 920167782  }
  0x2c   :  { %v1630_v63 = vmov 1326507024   ;;  %s1381_s12 = sshll.u32 %s1631_s11, 4  ;;  %s1632_s13 = smov [#allocation8]   ;;  %s1382_s12 = int_to_ptr.vmem [resolvable:$true] %s1381_s12 }
  0x2d   :  { %s1393_s14 = sshll.u32 %s1632_s13, 4  ;;  %s1567_s15 = scalar_lea.vmem %s1382_s12, 768  ;;  %s2187_s14 = int_to_ptr.vmem [resolvable:$true] %s1393_s14 }
  0x2e   :  { %65 = vperm.xlu1 %1498, %v44_v3   ;;  %55 = vperm.xlu0 %1497, %v42_v4   ;;  %p1568_p2 = scmp.ne.s32.totalorder %s1382_s12, %s1567_s15  ;;  %p1572_p3 = scmp.lt.s32.totalorder %s1382_s12, %s1382_s12 }
  0x2f   :  { %p1573_p4 = scmp.lt.s32.totalorder %s1567_s15, %s1567_s15 }
  0x31   :  { %p1574_p5 = por %p1573_p4, %p1572_p3 }
  0x32   :  { %75 = vperm.xlu1 %1498, %v46_v5   ;;  %70 = vperm.xlu0 %1497, %v45_v6  }
  0x33   :  { %p1575_p6 = pnand %p1574_p5, %p1568_p2 }
  0xa9   :  { %v61_v8 = vpop.permute.xlu1 %60  ;;  %v51_v9 = vpop.permute.xlu0 %50 }
  0xaa   :  { %v84_v10 = vmul.f32 %v1410_v7, %v51_v9  ;;  %v86_v11 = vmul.f32 %v1410_v7, %v61_v8 }
  0xac   :  { %96 = vrot.lane.b32.xlu0 %v84_v10, %s1624_s1 }
  0xad   :  { %v66_v12 = vpop.permute.xlu1 %65  ;;  %v56_v13 = vpop.permute.xlu0 %55 }
  0xae   :  { %v85_v14 = vmul.f32 %v1410_v7, %v56_v13  ;;  %v1680_v16 = vmul.f32 %v1410_v7, %v66_v12 }
  0xb0   :  { %100 = vrot.lane.b32.xlu0 %v86_v11, %s1624_s1  ;;  %98 = vrot.lane.b32.xlu1 %v85_v14, %s1624_s1 }
  0xb1   :  { %v71_v15 = vpop.permute.xlu0 %70  ;;  %v76_v18 = vpop.permute.xlu1 %75 }
  0xb2   :  { %v1682_v17 = vmul.f32 %v1410_v7, %v71_v15  ;;  %v1686_v19 = vmul.f32 %v1410_v7, %v76_v18 }
  0xb4   :  { %102 = vrot.lane.b32.xlu1 %v1680_v16, %s1624_s1  ;;  %104 = vrot.lane.b32.xlu0 %v1682_v17, %s1624_s1 }
  0xb8   :  { %106 = vrot.lane.b32.xlu1 %v1686_v19, %s1624_s1 }
 0x11e   :  { %v97_v20 = vpop.permute.xlu0 %96 }
 0x11f   :  { %v1690_v21 = vsel %vm114_vm0, %v84_v10, %v97_v20 }
 0x120   :  { %v121_v22 = vand.u32 2147483647, %v1690_v21  ;;  %v124_v23 = vand.u32 2139095040, %v1690_v21  ;;  %vm123_vm14 = vcmp.lt.s32.totalorder %v1690_v21, 0 }
 0x122   :  { %v125_v24 = vshrl.u32 %v124_v23, 23  ;;  %v99_v25 = vpop.permute.xlu1 %98  ;;  %v101_v26 = vpop.permute.xlu0 %100  ;;  %v128_v27 = vand.u32 8388607, %v121_v22  ;;  %vm1786_vm15 = vcmp.le.f32.partialorder %v121_v22, 0.7853982 }
 0x123   :  { %v1697_v28 = vsel %vm114_vm0, %v85_v14, %v99_v25  ;;  %v1701_v31 = vsel %vm114_vm0, %v86_v11, %v101_v26 }
 0x124   :  { %v1411_v29 = vadd.s32 4294967169, %v125_v24  ;;  %v224_v30 = vand.u32 2147483647, %v1697_v28  ;;  %v227_v32 = vand.u32 2139095040, %v1697_v28  ;;  %v129_v34 = vor.u32 8388608, %v128_v27 }
 0x125   :  { %v330_v37 = vand.u32 2139095040, %v1701_v31  ;;  %v327_v27 = vand.u32 2147483647, %v1701_v31 }
 0x126   :  { %v131_v33 = vadd.s32 1, %v1411_v29  ;;  %v228_v35 = vshrl.u32 %v227_v32, 23  ;;  %v231_v36 = vand.u32 8388607, %v224_v30  ;;  %v1707_v43 = vshll.u32 %v129_v34, 8 }
 0x127   :  { %v331_v40 = vshrl.u32 %v330_v37, 23 }
 0x128   :  { %vm132_vm1 = vcmp.gt.s32.totalorder %v131_v33, 0  ;;  %v1415_v39 = vadd.s32 4294967169, %v228_v35  ;;  %v232_v44 = vor.u32 8388608, %v231_v36 }
 0x129   :  { %v133_v38 = vsel %vm132_vm1, %v131_v33, 0  ;;  %v1419_v51 = vadd.s32 4294967169, %v331_v40 }
 0x12a   :  { %v134_v41 = vshrl.u32 %v133_v38, 5  ;;  %v135_v42 = vand.u32 31, %v133_v38  ;;  %v234_v45 = vadd.s32 1, %v1415_v39  ;;  %v1729_v26 = vshll.u32 %v232_v44, 8 }
 0x12b   :  { %v337_v37 = vadd.s32 1, %v1419_v51 }
 0x12c   :  { %v136_v46 = vsub.s32 32, %v135_v42  ;;  %v138_v48 = vshll.u32 %v1625_v47, %v135_v42  ;;  %v141_v50 = vshll.u32 %v1626_v49, %v135_v42  ;;  %v144_v53 = vshll.u32 %v1627_v52, %v135_v42 }
 0x12d   :  { %v147_v55 = vshll.u32 %v1628_v54, %v135_v42  ;;  %v150_v57 = vshll.u32 %v1629_v56, %v135_v42  ;;  %vm153_vm2 = vcmp.lt.s32.totalorder %v134_v41, 1  ;;  %vm154_vm3 = vcmp.lt.s32.totalorder %v134_v41, 2 }
 0x12e   :  { %v139_v58 = vshrl.u32 %v1626_v49, %v136_v46  ;;  %v142_v59 = vshrl.u32 %v1627_v52, %v136_v46  ;;  %v145_v60 = vshrl.u32 %v1628_v54, %v136_v46  ;;  %v137_v61 = vshrl.u32 %v1625_v47, %v136_v46 }
 0x12f   :  { %v148_v62 = vshrl.u32 %v1629_v56, %v136_v46  ;;  %v151_v0 = vshrl.u32 %v1630_v63, %v136_v46  ;;  %vm155_vm4 = vcmp.lt.s32.totalorder %v134_v41, 3  ;;  %vm235_vm5 = vcmp.gt.s32.totalorder %v234_v45, 0 }
 0x130   :  { %v140_v1 = vor.u32 %v139_v58, %v138_v48  ;;  %v143_v2 = vor.u32 %v142_v59, %v141_v50  ;;  %v146_v3 = vor.u32 %v145_v60, %v144_v53  ;;  %vm156_vm6 = vcmp.lt.s32.totalorder %v134_v41, 4 }
 0x131   :  { %v149_v4 = vor.u32 %v148_v62, %v147_v55  ;;  %v152_v5 = vor.u32 %v151_v0, %v150_v57  ;;  %v236_v6 = vsel %vm235_vm5, %v234_v45, 0  ;;  %vm338_vm11 = vcmp.gt.s32.totalorder %v337_v37, 0 }
 0x132   :  { %v157_v7 = vsel %vm153_vm2, %v137_v61, %v140_v1  ;;  %v158_v8 = vsel %vm156_vm6, %v146_v3, 2102212464  ;;  %v161_v9 = vsel %vm153_vm2, %v140_v1, %v143_v2  ;;  %v165_v10 = vsel %vm153_vm2, %v143_v2, %v146_v3 }
 0x133   :  { %v159_v11 = vsel %vm155_vm4, %v143_v2, %v158_v8  ;;  %v162_v12 = vsel %vm156_vm6, %v149_v4, 920167782  ;;  %v166_v13 = vsel %vm156_vm6, %v152_v5, 1326507024  ;;  %v237_v14 = vshrl.u32 %v236_v6, 5 }
 0x134   :  { %v160_v15 = vsel %vm154_vm3, %v157_v7, %v159_v11  ;;  %v163_v18 = vsel %vm155_vm4, %v146_v3, %v162_v12  ;;  %v167_v20 = vsel %vm155_vm4, %v149_v4, %v166_v13  ;;  %v238_v23 = vand.u32 31, %v236_v6 }
 0x135   :  { %v164_v24 = vsel %vm154_vm3, %v161_v9, %v163_v18  ;;  %v168_v25 = vsel %vm154_vm3, %v165_v10, %v167_v20  ;;  %v176_v35 = vmul.u32 %v1707_v43, %v160_v15  ;;  %vm256_vm7 = vcmp.lt.s32.totalorder %v237_v14, 1 }
 0x136   :  { %v1733_v29 = vmul.u32.u64.low %v1707_v43, %v168_v25  ;;  %v1734_v32 = vmul.u32.u64.high %v1707_v43, %v168_v25, %v1733_v29  ;;  %v1737_v33 = vmul.u32.u64.low %v1707_v43, %v164_v24  ;;  %v1738_v34 = vmul.u32.u64.high %v1707_v43, %v164_v24, %v1737_v33 }
 0x137   :  { %v239_v36 = vsub.s32 32, %v238_v23  ;;  %v241_v38 = vshll.u32 %v1625_v47, %v238_v23  ;;  %v244_v39 = vshll.u32 %v1626_v49, %v238_v23  ;;  %v247_v40 = vshll.u32 %v1627_v52, %v238_v23 }
 0x138   :  { %v250_v41 = vshll.u32 %v1628_v54, %v238_v23  ;;  %v253_v46 = vshll.u32 %v1629_v56, %v238_v23  ;;  %vm178_vm8 = vc.u32 %v1734_v32, %v1737_v33  ;;  %v179_v43 = vadd.s32 1, %v1738_v34 }
 0x139   :  { %v242_v42 = vshrl.u32 %v1626_v49, %v239_v36  ;;  %v245_v44 = vshrl.u32 %v1627_v52, %v239_v36  ;;  %v248_v45 = vshrl.u32 %v1628_v54, %v239_v36  ;;  %v251_v48 = vshrl.u32 %v1629_v56, %v239_v36 }
 0x13a   :  { %vm257_vm9 = vcmp.lt.s32.totalorder %v237_v14, 2  ;;  %v254_v55 = vshrl.u32 %v1630_v63, %v239_v36  ;;  %v180_v57 = vsel %vm178_vm8, %v179_v43, %v1738_v34  ;;  %v240_v58 = vshrl.u32 %v1625_v47, %v239_v36  ;;  %v103_v34 = vpop.permute.xlu1 %102 }
 0x13b   :  { %v243_v50 = vor.u32 %v242_v42, %v241_v38  ;;  %v246_v51 = vor.u32 %v245_v44, %v244_v39  ;;  %v249_v53 = vor.u32 %v248_v45, %v247_v40  ;;  %v252_v59 = vor.u32 %v251_v48, %v250_v41 }
 0x13c   :  { %vm259_vm10 = vcmp.lt.s32.totalorder %v237_v14, 4  ;;  %v181_v60 = vadd.s32 %v180_v57, %v176_v35  ;;  %v255_v61 = vor.u32 %v254_v55, %v253_v46  ;;  %vm258_vm12 = vcmp.lt.s32.totalorder %v237_v14, 3 }
 0x13d   :  { %v261_v62 = vsel %vm259_vm10, %v249_v53, 2102212464  ;;  %v264_v0 = vsel %vm256_vm7, %v243_v50, %v246_v51  ;;  %v265_v1 = vsel %vm259_vm10, %v252_v59, 920167782  ;;  %v268_v2 = vsel %vm256_vm7, %v246_v51, %v249_v53 }
 0x13e   :  { %v182_v3 = vadd.s32 536870912, %v181_v60  ;;  %v260_v4 = vsel %vm256_vm7, %v240_v58, %v243_v50  ;;  %v266_v5 = vsel %vm258_vm12, %v249_v53, %v265_v1  ;;  %v269_v6 = vsel %vm259_vm10, %v255_v61, 1326507024 }
 0x13f   :  { %v262_v7 = vsel %vm258_vm12, %v246_v51, %v261_v62  ;;  %v267_v8 = vsel %vm257_vm9, %v264_v0, %v266_v5  ;;  %v270_v9 = vsel %vm258_vm12, %v252_v59, %v269_v6  ;;  %v339_v10 = vsel %vm338_vm11, %v337_v37, 0 }
 0x140   :  { %v183_v11 = vshrl.u32 %v182_v3, 30  ;;  %v271_v12 = vsel %vm257_vm9, %v268_v2, %v270_v9  ;;  %v1763_v13 = vmul.u32.u64.low %v1729_v26, %v267_v8  ;;  %v1764_v15 = vmul.u32.u64.high %v1729_v26, %v267_v8, %v1763_v13 }
 0x141   :  { %v1768_v18 = vmul.u32.u64.low %v1729_v26, %v271_v12  ;;  %v1769_v20 = vmul.u32.u64.high %v1729_v26, %v271_v12, %v1768_v18  ;;  %v334_v23 = vand.u32 8388607, %v327_v27  ;;  %v263_v25 = vsel %vm257_vm9, %v260_v4, %v262_v7 }
 0x142   :  { %v184_v24 = vshll.u32 %v183_v11, 30  ;;  %v341_v29 = vand.u32 31, %v339_v10  ;;  %v282_v36 = vadd.s32 1, %v1764_v15  ;;  %v279_v37 = vmul.u32 %v1729_v26, %v263_v25 }
 0x143   :  { %vm281_vm13 = vc.u32 %v1769_v20, %v1763_v13  ;;  %v335_v38 = vor.u32 8388608, %v334_v23  ;;  %v1781_v42 = vsel %vm114_vm0, %v1680_v16, %v103_v34  ;;  %v177_v48 = vadd.s32 %v1737_v33, %v1734_v32 }
 0x144   :  { %v185_v35 = vsub.s32 %v181_v60, %v184_v24  ;;  %v283_v40 = vsel %vm281_vm13, %v282_v36, %v1764_v15  ;;  %v342_v41 = vsub.s32 32, %v341_v29  ;;  %v430_v43 = vand.u32 2147483647, %v1781_v42 }
 0x145   :  { %v284_v14 = vadd.s32 %v283_v40, %v279_v37  ;;  %v1790_v46 = vshll.u32 %v335_v38, 8  ;;  %v207_v50 = vsub.s32 4, %v183_v11  ;;  %v340_v55 = vshrl.u32 %v339_v10, 5 }
 0x146   :  { %v187_v39 = vsub.s32 0, %v185_v35  ;;  %v345_v51 = vshrl.u32 %v1626_v49, %v342_v41  ;;  %v351_v22 = vshrl.u32 %v1628_v54, %v342_v41  ;;  %v433_v57 = vand.u32 2139095040, %v1781_v42 }
 0x147   :  { %v285_v45 = vadd.s32 536870912, %v284_v14  ;;  %v344_v59 = vshll.u32 %v1625_v47, %v341_v29  ;;  %v348_v60 = vshrl.u32 %v1627_v52, %v342_v41  ;;  %v354_v61 = vshrl.u32 %v1629_v56, %v342_v41 }
 0x148   :  { %v1412_v44 = vmin.u32 %v187_v39, %v185_v35  ;;  %v347_v33 = vshll.u32 %v1626_v49, %v341_v29  ;;  %v350_v62 = vshll.u32 %v1627_v52, %v341_v29  ;;  %v357_v0 = vshrl.u32 %v1630_v63, %v342_v41 }
 0x149   :  { %v1796_v53 = vshrl.u32 %v285_v45, 30  ;;  %v208_v1 = vsel %vm123_vm14, %v207_v50, %v183_v11  ;;  %v346_v2 = vor.u32 %v345_v51, %v344_v59  ;;  %v353_v3 = vshll.u32 %v1628_v54, %v341_v29 }
 0x14a   :  { %v189_v16 = vclz %v1412_v44  ;;  %v352_v6 = vor.u32 %v351_v22, %v350_v62  ;;  %v356_v7 = vshll.u32 %v1629_v56, %v341_v29  ;;  %v349_v10 = vor.u32 %v348_v60, %v347_v33 }
 0x14b   :  { %v287_v32 = vshll.u32 %v1796_v53, 30  ;;  %v355_v12 = vor.u32 %v354_v61, %v353_v3  ;;  %v1815_v15 = vsel %vm1786_vm15, 0, %v208_v1  ;;  %v343_v11 = vshrl.u32 %v1625_v47, %v342_v41 }
 0x14c   :  { %v1413_v58 = vadd.s32 4294967294, %v189_v16  ;;  %v358_v23 = vor.u32 %v357_v0, %v356_v7  ;;  %vm362_vm2 = vcmp.lt.s32.totalorder %v340_v55, 4  ;;  %vm359_vm3 = vcmp.lt.s32.totalorder %v340_v55, 1 }
 0x14d   :  { %v1810_v5 = vsub.s32 %v284_v14, %v287_v32  ;;  %vm361_vm4 = vcmp.lt.s32.totalorder %v340_v55, 3  ;;  %v364_v29 = vsel %vm362_vm2, %v352_v6, 2102212464  ;;  %v367_v39 = vsel %vm359_vm3, %v346_v2, %v349_v10 }
 0x14e   :  { %vm1414_vm1 = vcmp.lt.s32.totalorder %v1413_v58, 0  ;;  %v368_v40 = vsel %vm362_vm2, %v355_v12, 920167782  ;;  %vm226_vm5 = vcmp.lt.s32.totalorder %v1697_v28, 0  ;;  %v371_v41 = vsel %vm359_vm3, %v349_v10, %v352_v6 }
 0x14f   :  { %v192_v4 = vsel %vm1414_vm1, 0, %v1413_v58  ;;  %v290_v18 = vsub.s32 0, %v1810_v5  ;;  %v369_v44 = vsel %vm361_vm4, %v352_v6, %v368_v40  ;;  %v372_v45 = vsel %vm362_vm2, %v358_v23, 1326507024 }
 0x150   :  { %v193_v8 = vsub.s32 32, %v192_v4  ;;  %v197_v9 = vsub.s32 4294967266, %v192_v4  ;;  %v194_v24 = vshll.u32 %v185_v35, %v192_v4  ;;  %vm360_vm6 = vcmp.lt.s32.totalorder %v340_v55, 2 }
 0x151   :  { %v1416_v36 = vmin.u32 %v290_v18, %v1810_v5  ;;  %v365_v16 = vsel %vm361_vm4, %v349_v10, %v364_v29  ;;  %v370_v22 = vsel %vm360_vm6, %v367_v39, %v369_v44  ;;  %v373_v58 = vsel %vm361_vm4, %v355_v12, %v372_v45  ;;  %v105_v29 = vpop.permute.xlu0 %104 }
 0x152   :  { %v195_v25 = vshrl.u32 %v177_v48, %v193_v8  ;;  %v198_v34 = vadd.s32 127, %v197_v9  ;;  %v363_v48 = vsel %vm359_vm3, %v343_v11, %v346_v2  ;;  %v374_v60 = vsel %vm360_vm6, %v371_v41, %v373_v58 }
 0x153   :  { %v292_v14 = vclz %v1416_v36  ;;  %v1825_v61 = vmul.u32.u64.low %v1790_v46, %v370_v22  ;;  %v1826_v32 = vmul.u32.u64.high %v1790_v46, %v370_v22, %v1825_v61  ;;  %v366_v33 = vsel %vm360_vm6, %v363_v48, %v365_v16 }
 0x154   :  { %v196_v37 = vor.u32 %v195_v25, %v194_v24  ;;  %v199_v38 = vshll.u32 %v198_v34, 23  ;;  %v1830_v62 = vmul.u32.u64.low %v1790_v46, %v374_v60  ;;  %v1831_v0 = vmul.u32.u64.high %v1790_v46, %v374_v60, %v1830_v62 }
 0x155   :  { %v1417_v51 = vadd.s32 4294967294, %v292_v14  ;;  %v310_v3 = vsub.s32 4, %v1796_v53  ;;  %v434_v4 = vshrl.u32 %v433_v57, 23  ;;  %v832_v55 = vadd.s32 3, %v1815_v15 }
 0x156   :  { %v200_v35 = vor.u32 4788187, %v199_v38  ;;  %v203_v50 = vcvt.s32.f32 %v196_v37  ;;  %v280_v6 = vadd.s32 %v1763_v13, %v1769_v20  ;;  %v382_v10 = vmul.u32 %v1790_v46, %v366_v33 }
 0x157   :  { %vm1418_vm7 = vcmp.lt.s32.totalorder %v1417_v51, 0  ;;  %v385_v12 = vadd.s32 1, %v1826_v32  ;;  %v1423_v18 = vadd.s32 4294967169, %v434_v4  ;;  %vm384_vm8 = vc.u32 %v1831_v0, %v1825_v61 }
 0x158   :  { %v201_v59 = vand.u32 2147483647, %v200_v35  ;;  %v295_v2 = vsel %vm1418_vm7, 0, %v1417_v51  ;;  %v311_v13 = vsel %vm226_vm5, %v310_v3, %v1796_v53  ;;  %vm1853_vm9 = vcmp.le.f32.partialorder %v224_v30, 0.7853982 }
 0x159   :  { %v296_v7 = vsub.s32 32, %v295_v2  ;;  %v300_v8 = vsub.s32 4294967266, %v295_v2  ;;  %v297_v11 = vshll.u32 %v1810_v5, %v295_v2  ;;  %v386_v20 = vsel %vm384_vm8, %v385_v12, %v1826_v32 }
 0x15a   :  { %v204_v1 = vmul.f32 %v203_v50, %v201_v59  ;;  %v440_v46 = vadd.s32 1, %v1423_v18  ;;  %v387_v36 = vadd.s32 %v386_v20, %v382_v10  ;;  %v437_v53 = vand.u32 8388607, %v430_v43 }
 0x15b   :  { %v298_v23 = vshrl.u32 %v280_v6, %v296_v7  ;;  %v301_v24 = vadd.s32 127, %v300_v8  ;;  %v313_v26 = vsel %vm1853_vm9, 0, %v311_v13  ;;  %v214_v40 = vand.u32 3, %v1815_v15 }
 0x15c   :  { %v205_v9 = vxor.u32 2147483648, %v204_v1  ;;  %vm441_vm10 = vcmp.gt.s32.totalorder %v440_v46, 0  ;;  %v388_v39 = vadd.s32 536870912, %v387_v36  ;;  %v833_v14 = vand.u32 3, %v832_v55 }
 0x15d   :  { %v299_v5 = vor.u32 %v298_v23, %v297_v11  ;;  %v302_v34 = vshll.u32 %v301_v24, 23  ;;  %v442_v44 = vsel %vm441_vm10, %v440_v46, 0  ;;  %v1864_v30 = vsel %vm114_vm0, %v1682_v17, %v105_v29 }
 0x15e   :  { %v206_v57 = vsel %vm123_vm14, %v205_v9, %v204_v1  ;;  %v389_v35 = vshrl.u32 %v388_v39, 30  ;;  %v936_v48 = vadd.s32 3, %v313_v26  ;;  %v438_v16 = vor.u32 8388608, %v437_v53 }
 0x15f   :  { %v209_v25 = vsel %vm1786_vm15, %v1690_v21, %v206_v57  ;;  %v303_v38 = vor.u32 4788187, %v302_v34  ;;  %v306_v45 = vcvt.s32.f32 %v299_v5  ;;  %v1866_v50 = vand.u32 31, %v442_v44 }
 0x160   :  { %1499 = vcosq.f32 %v209_v25  ;;  %v390_v22 = vshll.u32 %v389_v35, 30  ;;  %v536_v58 = vand.u32 2139095040, %v1864_v30  ;;  %vm1363_vm11 = vcmask 261120  }
 0x161   :  { %1501 = vsinq.f32 %v209_v25  ;;  %v304_v41 = vand.u32 2147483647, %v303_v38  ;;  %vm215_vm12 = vcmp.lt.s32.totalorder %v214_v40, 2  ;;  %vm216_vm13 = vcmp.eq.s32.totalorder %v214_v40, 0 }
 0x162   :  { %vm219_vm14 = vcmp.eq.s32.totalorder %v214_v40, 2  ;;  %vm834_vm15 = vcmp.lt.s32.totalorder %v833_v14, 2  ;;  %vm835_vm1 = vcmp.eq.s32.totalorder %v833_v14, 0  ;;  %vm329_vm2 = vcmp.lt.s32.totalorder %v1701_v31, 0 }
 0x163   :  { %v307_v51 = vmul.f32 %v306_v45, %v304_v41  ;;  %vm213_vm3 = vweird.f32 %v1690_v21  ;;  %vm838_vm4 = vcmp.eq.s32.totalorder %v833_v14, 2  ;;  %v1871_v15 = vand.u32 3, %v313_v26 }
 0x164   :  { %v1873_v59 = vsub.s32 %v387_v36, %v390_v22  ;;  %v1875_v60 = vand.u32 3, %v936_v48  ;;  %v1879_v32 = vadd.s32 %v1825_v61, %v1831_v0  ;;  %v445_v33 = vsub.s32 32, %v1866_v50 }
 0x165   :  { %v308_v17 = vxor.u32 2147483648, %v307_v51  ;;  %v1882_v62 = vshll.u32 %v438_v16, 8  ;;  %v1887_v3 = vshrl.u32 %v442_v44, 5  ;;  %v1889_v4 = vshrl.u32 %v536_v58, 23 }
 0x166   :  { %v393_v2 = vsub.s32 0, %v1873_v59  ;;  %v413_v61 = vsub.s32 4, %v389_v35  ;;  %v447_v0 = vshll.u32 %v1625_v47, %v1866_v50  ;;  %v450_v7 = vshll.u32 %v1626_v49, %v1866_v50 }
 0x167   :  { %v309_v1 = vsel %vm226_vm5, %v308_v17, %v307_v51  ;;  %v453_v12 = vshll.u32 %v1627_v52, %v1866_v50  ;;  %v448_v11 = vshrl.u32 %v1626_v49, %v445_v33  ;;  %v454_v23 = vshrl.u32 %v1628_v54, %v445_v33 }
 0x168   :  { %v312_v6 = vsel %vm1853_vm9, %v1697_v28, %v309_v1  ;;  %v1420_v10 = vmin.u32 %v393_v2, %v1873_v59  ;;  %v456_v20 = vshll.u32 %v1628_v54, %v1866_v50  ;;  %v451_v5 = vshrl.u32 %v1627_v52, %v445_v33 }
 0x169   :  { %1503 = vcosq.f32 %v312_v6  ;;  %v457_v34 = vshrl.u32 %v1629_v56, %v445_v33  ;;  %vm322_vm5 = vcmp.eq.s32.totalorder %v1871_v15, 2  ;;  %vm942_vm6 = vcmp.eq.s32.totalorder %v1875_v60, 2 }
 0x16a   :  { %v1500_v55 = vpop.eup %1499  ;;  %1505 = vsinq.f32 %v312_v6  ;;  %v395_v13 = vclz %v1420_v10  ;;  %v1917_v53 = vsel %vm329_vm2, %v413_v61, %v389_v35  ;;  %vm319_vm7 = vcmp.eq.s32.totalorder %v1871_v15, 0 }
 0x16b   :  { %v1502_v8 = vpop.eup %1501  ;;  %v220_v9 = vxor.u32 2147483648, %v1500_v55  ;;  %vm939_vm8 = vcmp.eq.s32.totalorder %v1875_v60, 0  ;;  %v449_v39 = vor.u32 %v448_v11, %v447_v0  ;;  %v455_v40 = vor.u32 %v454_v23, %v453_v12 }
 0x16c   :  { %v217_v18 = vxor.u32 2147483648, %v1502_v8  ;;  %v1421_v37 = vadd.s32 4294967294, %v395_v13  ;;  %vm318_vm9 = vcmp.lt.s32.totalorder %v1871_v15, 2  ;;  %vm938_vm10 = vcmp.lt.s32.totalorder %v1875_v60, 2 }
 0x16d   :  { %v221_v24 = vsel %vm219_vm14, %v220_v9, %v1502_v8  ;;  %v840_v57 = vsel %vm838_vm4, %v220_v9, %v1502_v8  ;;  %v458_v14 = vor.u32 %v457_v34, %v456_v20  ;;  %v459_v21 = vshll.u32 %v1629_v56, %v1866_v50 }
 0x16e   :  { %v218_v46 = vsel %vm216_vm13, %v1500_v55, %v217_v18  ;;  %v837_v25 = vsel %vm835_vm1, %v1500_v55, %v217_v18  ;;  %v460_v44 = vshrl.u32 %v1630_v63, %v445_v33  ;;  %vm316_vm13 = vweird.f32 %v1697_v28 }
 0x16f   :  { %v222_v36 = vsel %vm215_vm12, %v218_v46, %v221_v24  ;;  %v841_v29 = vsel %vm834_vm15, %v837_v25, %v840_v57  ;;  %vm1422_vm12 = vcmp.lt.s32.totalorder %v1421_v37, 0  ;;  %v446_v45 = vshrl.u32 %v1625_v47, %v445_v33 }
 0x170   :  { %v223_v38 = vsel %vm213_vm3, nan, %v222_v36  ;;  %v842_v26 = vsel %vm213_vm3, nan, %v841_v29  ;;  %v398_v41 = vsel %vm1422_vm12, 0, %v1421_v37  ;;  %v452_v35 = vor.u32 %v451_v5, %v450_v7 }
 0x171   :  { %1364 = vst.msk [vmem:[#allocation7] sm:$0xff] %vm1363_vm11, %v223_v38  ;;  %1370 = vst.msk [vmem:[#allocation8] sm:$0xff] %vm1363_vm11, %v842_v26  ;;  %vm462_vm14 = vcmp.lt.s32.totalorder %v1887_v3, 1  ;;  %v399_v48 = vsub.s32 32, %v398_v41  ;;  %v403_v16 = vsub.s32 4294967266, %v398_v41  ;;  %v461_v51 = vor.u32 %v460_v44, %v459_v21  ;;  %v107_v21 = vpop.permute.xlu1 %106 }
 0x172   :  { %vm465_vm15 = vcmp.lt.s32.totalorder %v1887_v3, 4  ;;  %v400_v22 = vshll.u32 %v1873_v59, %v398_v41  ;;  %vm463_vm1 = vcmp.lt.s32.totalorder %v1887_v3, 2  ;;  %vm464_vm3 = vcmp.lt.s32.totalorder %v1887_v3, 3 }
 0x173   :  { %v471_v50 = vsel %vm465_vm15, %v458_v14, 920167782  ;;  %v1504_v58 = vpop.eup %1503  ;;  %v401_v17 = vshrl.u32 %v1879_v32, %v399_v48  ;;  %v404_v33 = vadd.s32 127, %v403_v16  ;;  %v466_v1 = vsel %vm462_vm14, %v446_v45, %v449_v39 }
 0x174   :  { %v467_v2 = vsel %vm465_vm15, %v455_v40, 2102212464  ;;  %v1506_v55 = vpop.eup %1505  ;;  %v323_v6 = vxor.u32 2147483648, %v1504_v58  ;;  %v470_v59 = vsel %vm462_vm14, %v449_v39, %v452_v35  ;;  %v472_v61 = vsel %vm464_vm3, %v455_v40, %v471_v50 }
 0x175   :  { %v474_v0 = vsel %vm462_vm14, %v452_v35, %v455_v40  ;;  %v320_v7 = vxor.u32 2147483648, %v1506_v55  ;;  %v402_v32 = vor.u32 %v401_v17, %v400_v22  ;;  %v405_v8 = vshll.u32 %v404_v33, 23 }
 0x176   :  { %v475_v9 = vsel %vm465_vm15, %v461_v51, 1326507024  ;;  %v324_v10 = vsel %vm322_vm5, %v323_v6, %v1506_v55  ;;  %v944_v12 = vsel %vm942_vm6, %v323_v6, %v1506_v55  ;;  %v468_v18 = vsel %vm464_vm3, %v452_v35, %v467_v2 }
 0x177   :  { %v476_v11 = vsel %vm464_vm3, %v458_v14, %v475_v9  ;;  %v321_v23 = vsel %vm319_vm7, %v1504_v58, %v320_v7  ;;  %v941_v24 = vsel %vm939_vm8, %v1504_v58, %v320_v7  ;;  %v406_v57 = vor.u32 4788187, %v405_v8 }
 0x178   :  { %v473_v13 = vsel %vm463_vm1, %v470_v59, %v472_v61  ;;  %v325_v20 = vsel %vm318_vm9, %v321_v23, %v324_v10  ;;  %v945_v46 = vsel %vm938_vm10, %v941_v24, %v944_v12  ;;  %v477_v25 = vsel %vm463_vm1, %v474_v0, %v476_v11 }
 0x179   :  { %v1427_v5 = vadd.s32 4294967169, %v1889_v4  ;;  %v326_v34 = vsel %vm316_vm13, nan, %v325_v20  ;;  %v946_v36 = vsel %vm316_vm13, nan, %v945_v46  ;;  %v407_v29 = vand.u32 2147483647, %v406_v57 }
 0x17a   :  { %v409_v37 = vcvt.s32.f32 %v402_v32  ;;  %1365 = vst.msk [vmem:[#allocation7 + $0x8] sm:$0xff] %vm1363_vm11, %v326_v34  ;;  %1371 = vst.msk [vmem:[#allocation8 + $0x8] sm:$0xff] %vm1363_vm11, %v946_v36  ;;  %v1982_v15 = vmul.u32.u64.low %v1882_v62, %v477_v25  ;;  %v1983_v60 = vmul.u32.u64.high %v1882_v62, %v477_v25, %v1982_v15  ;;  %vm1992_vm4 = vcmp.le.f32.partialorder %v327_v27, 0.7853982 }
 0x17b   :  { %v1986_v38 = vmul.u32.u64.low %v1882_v62, %v473_v13  ;;  %v1987_v26 = vmul.u32.u64.high %v1882_v62, %v473_v13, %v1986_v38  ;;  %v543_v39 = vadd.s32 1, %v1427_v5  ;;  %v469_v40 = vsel %vm463_vm1, %v466_v1, %v468_v18 }
 0x17c   :  { %v410_v4 = vmul.f32 %v409_v37, %v407_v29  ;;  %v533_v14 = vand.u32 2147483647, %v1864_v30  ;;  %v416_v41 = vsel %vm1992_vm4, 0, %v1917_v53  ;;  %v485_v3 = vmul.u32 %v1882_v62, %v469_v40 }
 0x17d   :  { %vm544_vm5 = vcmp.gt.s32.totalorder %v543_v39, 0  ;;  %vm487_vm6 = vc.u32 %v1983_v60, %v1986_v38  ;;  %v488_v27 = vadd.s32 1, %v1987_v26  ;;  %v2010_v16 = vsel %vm114_vm0, %v1686_v19, %v107_v21 }
 0x17e   :  { %v411_v44 = vxor.u32 2147483648, %v410_v4  ;;  %v545_v45 = vsel %vm544_vm5, %v543_v39, 0  ;;  %v2015_v51 = vand.u32 3, %v416_v41  ;;  %v540_v50 = vand.u32 8388607, %v533_v14 }
 0x17f   :  { %v547_v48 = vand.u32 31, %v545_v45  ;;  %v489_v22 = vsel %vm487_vm6, %v488_v27, %v1987_v26  ;;  %v1040_v58 = vadd.s32 3, %v416_v41  ;;  %v2020_v33 = vshrl.u32 %v545_v45, 5 }
 0x180   :  { %v412_v35 = vsel %vm329_vm2, %v411_v44, %v410_v4  ;;  %v490_v17 = vadd.s32 %v489_v22, %v485_v3  ;;  %v541_v11 = vor.u32 8388608, %v540_v50  ;;  %vm421_vm0 = vcmp.lt.s32.totalorder %v2015_v51, 2 }
 0x181   :  { %v415_v53 = vsel %vm1992_vm4, %v1701_v31, %v412_v35  ;;  %v548_v62 = vsub.s32 32, %v547_v48  ;;  %v550_v19 = vshll.u32 %v1625_v47, %v547_v48  ;;  %v553_v1 = vshll.u32 %v1626_v49, %v547_v48 }
 0x182   :  { %1507 = vcosq.f32 %v415_v53  ;;  %v491_v2 = vadd.s32 536870912, %v490_v17  ;;  %v556_v59 = vshll.u32 %v1627_v52, %v547_v48  ;;  %v559_v0 = vshll.u32 %v1628_v54, %v547_v48 }
 0x183   :  { %1509 = vsinq.f32 %v415_v53  ;;  %v551_v55 = vshrl.u32 %v1626_v49, %v548_v62  ;;  %v554_v6 = vshrl.u32 %v1627_v52, %v548_v62  ;;  %v557_v61 = vshrl.u32 %v1628_v54, %v548_v62 }
 0x184   :  { %v560_v7 = vshrl.u32 %v1629_v56, %v548_v62  ;;  %v563_v32 = vshrl.u32 %v1630_v63, %v548_v62  ;;  %v2031_v8 = vshrl.u32 %v491_v2, 30  ;;  %v562_v12 = vshll.u32 %v1629_v56, %v547_v48 }
 0x185   :  { %v552_v9 = vor.u32 %v551_v55, %v550_v19  ;;  %v555_v10 = vor.u32 %v554_v6, %v553_v1  ;;  %v1041_v18 = vand.u32 3, %v1040_v58  ;;  %v558_v23 = vor.u32 %v557_v61, %v556_v59 }
 0x186   :  { %v561_v24 = vor.u32 %v560_v7, %v559_v0  ;;  %v493_v57 = vshll.u32 %v2031_v8, 30  ;;  %v564_v13 = vor.u32 %v563_v32, %v562_v12  ;;  %vm565_vm2 = vcmp.lt.s32.totalorder %v2020_v33, 1 }
 0x187   :  { %vm568_vm7 = vcmp.lt.s32.totalorder %v2020_v33, 4  ;;  %vm419_vm8 = vweird.f32 %v1701_v31  ;;  %vm422_vm9 = vcmp.eq.s32.totalorder %v2015_v51, 0  ;;  %vm567_vm10 = vcmp.lt.s32.totalorder %v2020_v33, 3 }
 0x188   :  { %v573_v20 = vsel %vm565_vm2, %v552_v9, %v555_v10  ;;  %v574_v46 = vsel %vm568_vm7, %v561_v24, 920167782  ;;  %vm425_vm12 = vcmp.eq.s32.totalorder %v2015_v51, 2  ;;  %v494_v25 = vsub.s32 %v490_v17, %v493_v57 }
 0x189   :  { %vm566_vm13 = vcmp.lt.s32.totalorder %v2020_v33, 2  ;;  %v575_v5 = vsel %vm567_vm10, %v558_v23, %v574_v46  ;;  %vm1042_vm14 = vcmp.lt.s32.totalorder %v1041_v18, 2  ;;  %v581_v36 = vshll.u32 %v541_v11, 8 }
 0x18a   :  { %v576_v34 = vsel %vm566_vm13, %v573_v20, %v575_v5  ;;  %v639_v29 = vand.u32 2139095040, %v2010_v16  ;;  %vm1043_vm15 = vcmp.eq.s32.totalorder %v1041_v18, 0  ;;  %v496_v15 = vsub.s32 0, %v494_v25 }
 0x18b   :  { %v577_v26 = vsel %vm565_vm2, %v555_v10, %v558_v23  ;;  %v578_v4 = vsel %vm568_vm7, %v564_v13, 1326507024  ;;  %v2058_v21 = vmul.u32.u64.low %v581_v36, %v576_v34  ;;  %v2059_v44 = vmul.u32.u64.high %v581_v36, %v576_v34, %v2058_v21 }
 0x18c   :  { %v1508_v37 = vpop.eup %1507  ;;  %v579_v40 = vsel %vm567_vm10, %v561_v24, %v578_v4  ;;  %vm1046_vm1 = vcmp.eq.s32.totalorder %v1041_v18, 2  ;;  %v1424_v27 = vmin.u32 %v496_v15, %v494_v25  ;;  %v570_v45 = vsel %vm568_vm7, %v558_v23, 2102212464 }
 0x18d   :  { %v1510_v39 = vpop.eup %1509  ;;  %v426_v28 = vxor.u32 2147483648, %v1508_v37  ;;  %v549_v48 = vshrl.u32 %v1625_v47, %v548_v62  ;;  %v640_v53 = vshrl.u32 %v639_v29, 23  ;;  %v580_v17 = vsel %vm566_vm13, %v577_v26, %v579_v40 }
 0x18e   :  { %v423_v41 = vxor.u32 2147483648, %v1510_v39  ;;  %v498_v58 = vclz %v1424_v27  ;;  %v571_v62 = vsel %vm567_vm10, %v555_v10, %v570_v45  ;;  %v591_v7 = vadd.s32 1, %v2059_v44 }
 0x18f   :  { %v427_v35 = vsel %vm425_vm12, %v426_v28, %v1510_v39  ;;  %v1048_v3 = vsel %vm1046_vm1, %v426_v28, %v1510_v39  ;;  %v569_v2 = vsel %vm565_vm2, %v549_v48, %v552_v9  ;;  %v1431_v32 = vadd.s32 4294967169, %v640_v53 }
 0x190   :  { %v424_v22 = vsel %vm422_vm9, %v1508_v37, %v423_v41  ;;  %v1045_v50 = vsel %vm1043_vm15, %v1508_v37, %v423_v41  ;;  %v1425_v59 = vadd.s32 4294967294, %v498_v58  ;;  %v572_v0 = vsel %vm566_vm13, %v569_v2, %v571_v62 }
 0x191   :  { %v428_v19 = vsel %vm421_vm0, %v424_v22, %v427_v35  ;;  %v1049_v1 = vsel %vm1042_vm14, %v1045_v50, %v1048_v3  ;;  %v2085_v51 = vmul.u32.u64.low %v581_v36, %v580_v17  ;;  %v2086_v61 = vmul.u32.u64.high %v581_v36, %v580_v17, %v2085_v51 }
 0x192   :  { %v429_v55 = vsel %vm419_vm8, nan, %v428_v19  ;;  %v1050_v6 = vsel %vm419_vm8, nan, %v1049_v1  ;;  %vm1426_vm3 = vcmp.lt.s32.totalorder %v1425_v59, 0  ;;  %v636_v10 = vand.u32 2147483647, %v2010_v16 }
 0x193   :  { %1366 = vst.msk [vmem:[#allocation7 + $0x10] sm:$0xff] %vm1363_vm11, %v429_v55  ;;  %1372 = vst.msk [vmem:[#allocation8 + $0x10] sm:$0xff] %vm1363_vm11, %v1050_v6  ;;  %v501_v9 = vsel %vm1426_vm3, 0, %v1425_v59  ;;  %v486_v31 = vadd.s32 %v1986_v38, %v1983_v60  ;;  %v646_v11 = vadd.s32 1, %v1431_v32  ;;  %v516_v24 = vsub.s32 4, %v2031_v8 }
 0x194   :  { %v502_v12 = vsub.s32 32, %v501_v9  ;;  %v506_v18 = vsub.s32 4294967266, %v501_v9  ;;  %v503_v23 = vshll.u32 %v494_v25, %v501_v9  ;;  %v588_v57 = vmul.u32 %v581_v36, %v572_v0 }
 0x195   :  { %vm590_vm4 = vc.u32 %v2086_v61, %v2058_v21  ;;  %vm647_vm5 = vcmp.gt.s32.totalorder %v646_v11, 0  ;;  %vm432_vm6 = vcmp.lt.s32.totalorder %v1781_v42, 0  ;;  %v643_v37 = vand.u32 8388607, %v636_v10 }
 0x196   :  { %v504_v33 = vshrl.u32 %v486_v31, %v502_v12  ;;  %v507_v13 = vadd.s32 127, %v506_v18  ;;  %v592_v20 = vsel %vm590_vm4, %v591_v7, %v2059_v44  ;;  %v648_v5 = vsel %vm647_vm5, %v646_v11, 0 }
 0x197   :  { %v593_v46 = vadd.s32 %v592_v20, %v588_v57  ;;  %v650_v34 = vand.u32 31, %v648_v5  ;;  %v517_v25 = vsel %vm432_vm6, %v516_v24, %v2031_v8  ;;  %vm2106_vm0 = vcmp.le.f32.partialorder %v430_v43, 0.7853982 }
 0x198   :  { %v505_v60 = vor.u32 %v504_v33, %v503_v23  ;;  %v508_v38 = vshll.u32 %v507_v13, 23  ;;  %v519_v40 = vsel %vm2106_vm0, 0, %v517_v25  ;;  %v644_v41 = vor.u32 8388608, %v643_v37 }
 0x199   :  { %v594_v36 = vadd.s32 536870912, %v593_v46  ;;  %v651_v15 = vsub.s32 32, %v650_v34  ;;  %v1144_v35 = vadd.s32 3, %v519_v40  ;;  %v653_v22 = vshll.u32 %v1625_v47, %v650_v34 }
 0x19a   :  { %v509_v29 = vor.u32 4788187, %v508_v38  ;;  %v512_v28 = vcvt.s32.f32 %v505_v60  ;;  %v656_v50 = vshll.u32 %v1626_v49, %v650_v34  ;;  %v649_v19 = vshrl.u32 %v648_v5, 5 }
 0x19b   :  { %v2110_v4 = vshrl.u32 %v594_v36, 30  ;;  %v654_v27 = vshrl.u32 %v1626_v49, %v651_v15  ;;  %v657_v45 = vshrl.u32 %v1627_v52, %v651_v15  ;;  %v660_v3 = vshrl.u32 %v1628_v54, %v651_v15 }
 0x19c   :  { %v510_v39 = vand.u32 2147483647, %v509_v29  ;;  %v663_v48 = vshrl.u32 %v1629_v56, %v651_v15  ;;  %v666_v58 = vshrl.u32 %v1630_v63, %v651_v15  ;;  %v659_v1 = vshll.u32 %v1627_v52, %v650_v34 }
 0x19d   :  { %v596_v8 = vshll.u32 %v2110_v4, 30  ;;  %v662_v2 = vshll.u32 %v1628_v54, %v650_v34  ;;  %v655_v55 = vor.u32 %v654_v27, %v653_v22  ;;  %v658_v6 = vor.u32 %v657_v45, %v656_v50 }
 0x19e   :  { %v513_v44 = vmul.f32 %v512_v28, %v510_v39  ;;  %v665_v59 = vshll.u32 %v1629_v56, %v650_v34  ;;  %v661_v51 = vor.u32 %v660_v3, %v659_v1  ;;  %v523_v7 = vand.u32 3, %v519_v40 }
 0x19f   :  { %v2117_v43 = vsub.s32 %v593_v46, %v596_v8  ;;  %v664_v0 = vor.u32 %v663_v48, %v662_v2  ;;  %v1145_v54 = vand.u32 3, %v1144_v35  ;;  %vm668_vm2 = vcmp.lt.s32.totalorder %v649_v19, 1 }
 0x1a0   :  { %v514_v53 = vxor.u32 2147483648, %v513_v44  ;;  %v667_v52 = vor.u32 %v666_v58, %v665_v59  ;;  %v589_v9 = vadd.s32 %v2058_v21, %v2086_v61  ;;  %vm671_vm7 = vcmp.lt.s32.totalorder %v649_v19, 4 }
 0x1a1   :  { %v599_v17 = vsub.s32 0, %v2117_v43  ;;  %v676_v56 = vsel %vm668_vm2, %v655_v55, %v658_v6  ;;  %v684_v31 = vshll.u32 %v644_v41, 8  ;;  %vm670_vm8 = vcmp.lt.s32.totalorder %v649_v19, 3 }
 0x1a2   :  { %v515_v62 = vsel %vm432_vm6, %v514_v53, %v513_v44  ;;  %v677_v18 = vsel %vm671_vm7, %v664_v0, 920167782  ;;  %v680_v11 = vsel %vm668_vm2, %v658_v6, %v661_v51  ;;  %vm669_vm9 = vcmp.lt.s32.totalorder %v649_v19, 2 }
 0x1a3   :  { %v518_v49 = vsel %vm2106_vm0, %v1781_v42, %v515_v62  ;;  %v1428_v63 = vmin.u32 %v599_v17, %v2117_v43  ;;  %v673_v23 = vsel %vm671_vm7, %v661_v51, 2102212464  ;;  %v678_v24 = vsel %vm670_vm8, %v661_v51, %v677_v18 }
 0x1a4   :  { %1511 = vcosq.f32 %v518_v49  ;;  %v681_v57 = vsel %vm671_vm7, %v667_v52, 1326507024  ;;  %v652_v33 = vshrl.u32 %v1625_v47, %v651_v15  ;;  %v679_v13 = vsel %vm669_vm9, %v676_v56, %v678_v24 }
 0x1a5   :  { %1513 = vsinq.f32 %v518_v49  ;;  %v601_v32 = vclz %v1428_v63  ;;  %v682_v21 = vsel %vm670_vm8, %v664_v0, %v681_v57  ;;  %v674_v25 = vsel %vm670_vm8, %v658_v6, %v673_v23 }
 0x1a6   :  { %v683_v20 = vsel %vm669_vm9, %v680_v11, %v682_v21  ;;  %v2143_v46 = vmul.u32.u64.low %v684_v31, %v679_v13  ;;  %v2144_v5 = vmul.u32.u64.high %v684_v31, %v679_v13, %v2143_v46  ;;  %v672_v34 = vsel %vm668_vm2, %v652_v33, %v655_v55 }
 0x1a7   :  { %v1429_v12 = vadd.s32 4294967294, %v601_v32  ;;  %vm522_vm12 = vweird.f32 %v1781_v42  ;;  %v2150_v47 = vmul.u32.u64.low %v684_v31, %v683_v20  ;;  %v2151_v36 = vmul.u32.u64.high %v684_v31, %v683_v20, %v2150_v47 }
 0x1a8   :  { %vm524_vm13 = vcmp.lt.s32.totalorder %v523_v7, 2  ;;  %vm525_vm14 = vcmp.eq.s32.totalorder %v523_v7, 0  ;;  %vm528_vm15 = vcmp.eq.s32.totalorder %v523_v7, 2  ;;  %v675_v39 = vsel %vm669_vm9, %v672_v34, %v674_v25 }
 0x1a9   :  { %vm1430_vm10 = vcmp.lt.s32.totalorder %v1429_v12, 0  ;;  %v694_v28 = vadd.s32 1, %v2144_v5  ;;  %vm1146_vm1 = vcmp.lt.s32.totalorder %v1145_v54, 2  ;;  %vm1147_vm3 = vcmp.eq.s32.totalorder %v1145_v54, 0 }
 0x1aa   :  { %v604_v61 = vsel %vm1430_vm10, 0, %v1429_v12  ;;  %vm1150_vm4 = vcmp.eq.s32.totalorder %v1145_v54, 2  ;;  %vm693_vm5 = vc.u32 %v2151_v36, %v2143_v46  ;;  %v691_v3 = vmul.u32 %v684_v31, %v675_v39 }
 0x1ab   :  { %v605_v60 = vsub.s32 32, %v604_v61  ;;  %v609_v38 = vsub.s32 4294967266, %v604_v61  ;;  %v606_v29 = vshll.u32 %v2117_v43, %v604_v61  ;;  %v695_v50 = vsel %vm693_vm5, %v694_v28, %v2144_v5 }
 0x1ac   :  { %v696_v1 = vadd.s32 %v695_v50, %v691_v3  ;;  %v619_v55 = vsub.s32 4, %v2110_v4  ;;  %vm535_vm6 = vcmp.lt.s32.totalorder %v1864_v30, 0  ;;  %vm534_vm0 = vcmp.le.f32.partialorder %v533_v14, 0.7853982 }
 0x1ad   :  { %v607_v37 = vshrl.u32 %v589_v9, %v605_v60  ;;  %v610_v15 = vadd.s32 127, %v609_v38  ;;  %v692_v33 = vadd.s32 %v2143_v46, %v2151_v36 }
 0x1ae   :  { %v1512_v26 = vpop.eup %1511  ;;  %v697_v59 = vadd.s32 536870912, %v696_v1  ;;  %v620_v51 = vsel %vm535_vm6, %v619_v55, %v2110_v4 }
 0x1af   :  { %v1514_v40 = vpop.eup %1513  ;;  %v529_v8 = vxor.u32 2147483648, %v1512_v26  ;;  %v608_v44 = vor.u32 %v607_v37, %v606_v29  ;;  %v611_v41 = vshll.u32 %v610_v15, 23  ;;  %v622_v52 = vsel %vm534_vm0, 0, %v620_v51 }
 0x1b0   :  { %v526_v27 = vxor.u32 2147483648, %v1514_v40  ;;  %v698_v63 = vshrl.u32 %v697_v59, 30  ;;  %v1248_v9 = vadd.s32 3, %v622_v52  ;;  %v626_v31 = vand.u32 3, %v622_v52 }
 0x1b1   :  { %v530_v45 = vsel %vm528_vm15, %v529_v8, %v1514_v40  ;;  %v1152_v35 = vsel %vm1150_vm4, %v529_v8, %v1514_v40  ;;  %v612_v43 = vor.u32 4788187, %v611_v41  ;;  %v615_v22 = vcvt.s32.f32 %v608_v44 }
 0x1b2   :  { %v527_v48 = vsel %vm525_vm14, %v1512_v26, %v526_v27  ;;  %v1149_v53 = vsel %vm1147_vm3, %v1512_v26, %v526_v27  ;;  %v699_v42 = vshll.u32 %v698_v63, 30  ;;  %v1249_v18 = vand.u32 3, %v1248_v9 }
 0x1b3   :  { %v531_v58 = vsel %vm524_vm13, %v527_v48, %v530_v45  ;;  %v1153_v17 = vsel %vm1146_vm1, %v1149_v53, %v1152_v35  ;;  %v613_v19 = vand.u32 2147483647, %v612_v43  ;;  %vm627_vm2 = vcmp.lt.s32.totalorder %v626_v31, 2 }
 0x1b4   :  { %v532_v2 = vsel %vm522_vm12, nan, %v531_v58  ;;  %v1154_v62 = vsel %vm522_vm12, nan, %v1153_v17  ;;  %v700_v54 = vsub.s32 %v696_v1, %v699_v42  ;;  %vm628_vm7 = vcmp.eq.s32.totalorder %v626_v31, 0 }
 0x1b5   :  { %1367 = vst.msk [vmem:[#allocation7 + $0x18] sm:$0xff] %vm1363_vm11, %v532_v2  ;;  %1373 = vst.msk [vmem:[#allocation8 + $0x18] sm:$0xff] %vm1363_vm11, %v1154_v62  ;;  %v616_v6 = vmul.f32 %v615_v22, %v613_v19  ;;  %vm631_vm8 = vcmp.eq.s32.totalorder %v626_v31, 2  ;;  %vm1250_vm10 = vcmp.lt.s32.totalorder %v1249_v18, 2  ;;  %vm1254_vm12 = vcmp.eq.s32.totalorder %v1249_v18, 2 }
 0x1b6   :  { %v702_v32 = vsub.s32 0, %v700_v54  ;;  %vm1251_vm13 = vcmp.eq.s32.totalorder %v1249_v18, 0  ;;  %vm625_vm14 = vweird.f32 %v1864_v30  ;;  %v722_v8 = vsub.s32 4, %v698_v63 }
 0x1b7   :  { %v617_v49 = vxor.u32 2147483648, %v616_v6  ;;  %vm638_vm15 = vcmp.lt.s32.totalorder %v2010_v16, 0  ;;  %vm637_vm1 = vcmp.le.f32.partialorder %v636_v10, 0.7853982 }
 0x1b8   :  { %v1432_v56 = vmin.u32 %v702_v32, %v700_v54  ;;  %v723_v41 = vsel %vm638_vm15, %v722_v8, %v698_v63 }
 0x1b9   :  { %v618_v0 = vsel %vm535_vm6, %v617_v49, %v616_v6  ;;  %v725_v45 = vsel %vm637_vm1, 0, %v723_v41 }
 0x1ba   :  { %v621_v7 = vsel %vm534_vm0, %v1864_v30, %v618_v0  ;;  %v704_v12 = vclz %v1432_v56  ;;  %v1352_v35 = vadd.s32 3, %v725_v45  ;;  %v729_v43 = vand.u32 3, %v725_v45 }
 0x1bb   :  { %1515 = vcosq.f32 %v621_v7 }
 0x1bc   :  { %1517 = vsinq.f32 %v621_v7  ;;  %v1433_v11 = vadd.s32 4294967294, %v704_v12  ;;  %v1353_v3 = vand.u32 3, %v1352_v35  ;;  %vm734_vm3 = vcmp.eq.s32.totalorder %v729_v43, 2 }
 0x1bd   :  { %vm731_vm5 = vcmp.eq.s32.totalorder %v729_v43, 0  ;;  %vm730_vm0 = vcmp.lt.s32.totalorder %v729_v43, 2 }
 0x1be   :  { %vm1434_vm9 = vcmp.lt.s32.totalorder %v1433_v11, 0  ;;  %vm1358_vm4 = vcmp.eq.s32.totalorder %v1353_v3, 2  ;;  %vm1355_vm6 = vcmp.eq.s32.totalorder %v1353_v3, 0 }
 0x1bf   :  { %v707_v24 = vsel %vm1434_vm9, 0, %v1433_v11 }
 0x1c0   :  { %v708_v13 = vsub.s32 32, %v707_v24  ;;  %v712_v21 = vsub.s32 4294967266, %v707_v24  ;;  %v709_v5 = vshll.u32 %v700_v54, %v707_v24 }
 0x1c2   :  { %v710_v34 = vshrl.u32 %v692_v33, %v708_v13  ;;  %v713_v25 = vadd.s32 127, %v712_v21 }
 0x1c4   :  { %v711_v46 = vor.u32 %v710_v34, %v709_v5  ;;  %v714_v36 = vshll.u32 %v713_v25, 23 }
 0x1c5   :  { %v1516_v23 = vpop.eup %1515 }
 0x1c6   :  { %v1518_v14 = vpop.eup %1517  ;;  %v632_v4 = vxor.u32 2147483648, %v1516_v23  ;;  %v715_v26 = vor.u32 4788187, %v714_v36  ;;  %v718_v28 = vcvt.s32.f32 %v711_v46 }
 0x1c7   :  { %v629_v57 = vxor.u32 2147483648, %v1518_v14 }
 0x1c8   :  { %v633_v61 = vsel %vm631_vm8, %v632_v4, %v1518_v14  ;;  %v1256_v20 = vsel %vm1254_vm12, %v632_v4, %v1518_v14  ;;  %v716_v39 = vand.u32 2147483647, %v715_v26 }
 0x1c9   :  { %v630_v60 = vsel %vm628_vm7, %v1516_v23, %v629_v57  ;;  %v1253_v38 = vsel %vm1251_vm13, %v1516_v23, %v629_v57  ;;  %vm728_vm7 = vweird.f32 %v2010_v16 }
 0x1ca   :  { %v634_v47 = vsel %vm627_vm2, %v630_v60, %v633_v61  ;;  %v1257_v29 = vsel %vm1250_vm10, %v1253_v38, %v1256_v20  ;;  %v719_v40 = vmul.f32 %v718_v28, %v716_v39  ;;  %vm1354_vm2 = vcmp.lt.s32.totalorder %v1353_v3, 2 }
 0x1cb   :  { %v635_v37 = vsel %vm625_vm14, nan, %v634_v47  ;;  %v1258_v15 = vsel %vm625_vm14, nan, %v1257_v29 }
 0x1cc   :  { %1368 = vst.msk [vmem:[#allocation7 + $0x20] sm:$0xff] %vm1363_vm11, %v635_v37  ;;  %1374 = vst.msk [vmem:[#allocation8 + $0x20] sm:$0xff] %vm1363_vm11, %v1258_v15  ;;  %v720_v44 = vxor.u32 2147483648, %v719_v40 }
 0x1ce   :  { %v721_v30 = vsel %vm638_vm15, %v720_v44, %v719_v40 }
 0x1cf   :  { %v724_v27 = vsel %vm637_vm1, %v2010_v16, %v721_v30 }
 0x1d0   :  { %1519 = vcosq.f32 %v724_v27 }
 0x1d1   :  { %1521 = vsinq.f32 %v724_v27 }
 0x1da   :  { %v1520_v48 = vpop.eup %1519 }
 0x1db   :  { %v1522_v53 = vpop.eup %1521  ;;  %v735_v22 = vxor.u32 2147483648, %v1520_v48 }
 0x1dc   :  { %v732_v50 = vxor.u32 2147483648, %v1522_v53 }
 0x1dd   :  { %v736_v10 = vsel %vm734_vm3, %v735_v22, %v1522_v53  ;;  %v1360_v58 = vsel %vm1358_vm4, %v735_v22, %v1522_v53 }
 0x1de   :  { %v733_v17 = vsel %vm731_vm5, %v1520_v48, %v732_v50  ;;  %v1357_v19 = vsel %vm1355_vm6, %v1520_v48, %v732_v50 }
 0x1df   :  { %v737_v1 = vsel %vm730_vm0, %v733_v17, %v736_v10  ;;  %v1361_v2 = vsel %vm1354_vm2, %v1357_v19, %v1360_v58 }
 0x1e0   :  { %v738_v62 = vsel %vm728_vm7, nan, %v737_v1  ;;  %v1362_v55 = vsel %vm728_vm7, nan, %v1361_v2 }
 0x1e1   :  { %1369 = vst.msk [vmem:[#allocation7 + $0x28] sm:$0xff] %vm1363_vm11, %v738_v62  ;;  %1375 = vst.msk [vmem:[#allocation8 + $0x28] sm:$0xff] %vm1363_vm11, %v1362_v55 }
 0x1e2   :  { %1578 = shalt.err (!%p1575_p6)
}
 0x1e3   :  { %s1579_s18 = scalar_lea.hbm %s2228_s2, 768 }
 0x1e4   :  { %p1580_p7 = scmp.ne.s32.totalorder %s2228_s2, %s1579_s18  ;;  %p1583_p8 = scmp.lt.u32.totalorder %s1579_s18, %s2228_s2 }
 0x1e6   :  { %p1585_p9 = pnand %p1583_p8, %p1580_p7 }
 0x1e8   :  { %1588 = shalt.err (!%p1585_p9)
}
 0x1e9   :  { %1387 = dma.vmem_to_hbm [thread:$0]  %s1382_s12, 768, %s2228_s2, [#allocation4], %s1620_s22, %s1620_s22, %s1621_s23  }
 0x1ea   :  { %s1589_s27 = scalar_lea.vmem %s2187_s14, 768  ;;  %p1594_p11 = scmp.lt.s32.totalorder %s2187_s14, %s2187_s14 }
 0x1eb   :  { %p1590_p10 = scmp.ne.s32.totalorder %s2187_s14, %s1589_s27  ;;  %p1595_p12 = scmp.lt.s32.totalorder %s1589_s27, %s1589_s27 }
 0x1ed   :  { %p1596_p13 = por %p1595_p12, %p1594_p11 }
 0x1ef   :  { %p1597_p0 = pnand %p1596_p13, %p1590_p10 }
 0x1f1   :  { %1600 = shalt.err (!%p1597_p0)
}
 0x1f2   :  { %s1601_s30 = scalar_lea.hbm %s2229_s3, 768 }
 0x1f3   :  { %p1602_p1 = scmp.ne.s32.totalorder %s2229_s3, %s1601_s30  ;;  %p1605_p2 = scmp.lt.u32.totalorder %s1601_s30, %s2229_s3 }
 0x1f5   :  { %p1607_p3 = pnand %p1605_p2, %p1602_p1 }
 0x1f7   :  { %1610 = shalt.err (!%p1607_p3)
}
 0x1f8   :  { %1399 = dma.vmem_to_hbm [thread:$0]  %s2187_s14, 768, %s2229_s3, [#allocation9], %s1620_s22, %s1620_s22, %s1621_s23  }
 0x1f9   :  { %1615 = dma.done.wait [#allocation4], 768  }
 0x1fa   :  { %1616 = vsyncadd [#allocation4], 4294966528 }
 0x1fb   :  { %1617 = dma.done.wait [#allocation9], 768  }
 0x1fc   :  { %1618 = vsyncadd [#allocation9], 4294966528 }
 0x1fd   :  { %1406 = vsyncpa [#allocation3], 1 }
 0x1fe   :  { %1407 = vsyncpa [#allocation6], 1 }
 0x1ff   :  { %1408 = vsyncpa [#allocation4], 1 }
 0x200   :  { %1409 = vsyncpa [#allocation9], 1 }

</bundles_post_ra>
